<compile_context>
chip_gen: v5e
topology: v5e:2x2
jax: 0.10.0
libtpu: 0.0.40
codegen_flags: <defaults>
</compile_context>

<pallas_src>
import functools

import jax
import jax.numpy as jnp
from jax.experimental import pallas as pl
from jax.experimental.pallas import tpu as pltpu

INPUT_SIZE = 4
HIDDEN_SIZE = 64
OUTPUT_SIZE = 2
TIMESTEPS = 8
ALPHA = 0.9       # FastVectorLIFCell alpha
THRESHOLD = 1.0   # FastVectorLIFCell threshold

LANES = 128
PACK = LANES // HIDDEN_SIZE          # 2 batch rows packed per vreg row


# ------------------------------- small utils ------------------------------- #

def _round_up(x, m):
    return ((x + m - 1) // m) * m


def _tile_rows(rows):
    """Packed-row (sublane) tile for the batch grid axis."""
    if rows <= 8:
        return rows                  # single block equal to the full array
    MAX_TILE = 256                   # 256 packed rows == 512 batch elements
    g = max(2, -(-rows // MAX_TILE))  # >=2 grid steps so v7x uses both TCs
    return _round_up(-(-rows // g), 8)


# ----------------------------- kernel helpers ------------------------------ #

def _lif_step(xt, m, ss):
    # TODO(synk): LIFCell itself is not defined in the reference source; we use
    # the standard leaky integrate-and-fire update v = alpha*m + x with a hard
    # >= threshold.  The FastVectorLIFCell reset m = v*(1-z) + alpha*v*z is
    # implemented exactly (mask form: where(z, alpha*v, v)).
    v = ALPHA * m + xt
    zb = v >= THRESHOLD
    m_next = jnp.where(zb, ALPHA * v, v)
    ss_next = jnp.where(zb, ss + 1.0, ss)
    return m_next, ss_next


def _project_packed(x, wc):
    # x: [R, K] (K tiny), wc: [K, PACK*H] zero-padded per batch slot.
    # K broadcast-FMAs on the VPU; the MXU would be <1% utilized at D=4.
    K = wc.shape[0]
    acc = x[:, 0:1] * wc[0:1, :]
    for k in range(1, K):
        acc = acc + x[:, k:k + 1] * wc[k:k + 1, :]
    return acc


def _readout_packed(ss, wout, bout):
    # ss: [R, PACK*H] packed spike sums, wout: [A, PACK*H] (pre-scaled by 1/T,
    # tiled over both halves), bout: [1, PACK*A].
    # Returns the full [R, PACK*A] tile (slot p's logits in cols p*A..p*A+A-1)
    # so the caller can do one lane-dense store.
    A = wout.shape[0]
    H = wout.shape[1] // PACK
    cols = [None] * (PACK * A)
    for a in range(A):
        prod = ss * wout[a:a + 1, :]                 # one full-width vmul
        for p in range(PACK):
            cols[p * A + a] = jnp.sum(prod[:, p * H:(p + 1) * H],
                                      axis=-1, keepdims=True)
    return jnp.concatenate(cols, axis=1) + bout


# --------------------------------- kernels --------------------------------- #

def snn_policy_kernel(x_ref, wc_ref, wout_ref, bout_ref, o_ref, *, timesteps):
    """get_action fast path: the state is constant over the T timesteps, so the
    fused input projection is computed once and reused every LIF step."""
    xt = _project_packed(x_ref[...], wc_ref[...])    # [R, PACK*H]
    m = jnp.zeros_like(xt)
    ss = jnp.zeros_like(xt)
    for _ in range(timesteps):                       # static unroll, pure VPU
        m, ss = _lif_step(xt, m, ss)
    o_ref[...] = _readout_packed(ss, wout_ref[...], bout_ref[...])


def snn_seq_kernel(x_ref, wc_ref, wout_ref, bout_ref, o_ref, *,
                   timesteps, input_size):
    """General forward: x_ref is [R, PACK*T*D]; batch slot p's whole sequence
    lives in columns [p*T*D, (p+1)*T*D).  The projection is done per timestep
    so no [T*B, H] intermediate is ever materialized."""
    x = x_ref[...]
    wc = wc_ref[...]                                 # [PACK*D, PACK*H]
    D = input_size
    TD = timesteps * D
    R = x.shape[0]
    PH = wc.shape[1]
    m = jnp.zeros((R, PH), jnp.float32)
    ss = jnp.zeros((R, PH), jnp.float32)
    for t in range(timesteps):                       # static unroll
        xt = None
        for p in range(PACK):
            for k in range(D):
                c = p * TD + t * D + k               # static lane index
                term = x[:, c:c + 1] * wc[p * D + k:p * D + k + 1, :]
                xt = term if xt is None else xt + term
        m, ss = _lif_step(xt, m, ss)
    o_ref[...] = _readout_packed(ss, wout_ref[...], bout_ref[...])


# -------------------------------- wrappers --------------------------------- #

def prepare_params(w_enc, w_fc, w_out, b_out, timesteps=TIMESTEPS):
    """One-time parameter prep: fuse the two bias-free linears, fold the 1/T
    spike-mean into the readout, and pre-pack everything for the 2-rows-per-
    vreg layout used inside the kernels."""
    D, H = w_enc.shape
    A = w_out.shape[1]
    wc = jnp.dot(w_enc, w_fc, precision=jax.lax.Precision.HIGHEST)  # [D, H]
    # Zero-padded packed projection weight: row p*D+k feeds only batch slot p's
    # lanes [p*H, (p+1)*H).
    wc_packed = jnp.zeros((PACK * D, PACK * H), jnp.float32)
    for p in range(PACK):
        wc_packed = wc_packed.at[p * D:(p + 1) * D, p * H:(p + 1) * H].set(wc)
    wout_t = jnp.transpose(w_out) * (1.0 / timesteps)               # [A, H]
    wout_packed = jnp.tile(wout_t, (1, PACK))                       # [A, PACK*H]
    bout_packed = jnp.tile(b_out.reshape(1, A), (1, PACK))          # [1, PACK*A]
    return wc_packed, wout_packed, bout_packed


def _pack_and_pad(x2d, tile_from_rows=True):
    """[N, C] -> zero-padded packed slab [R, PACK*C]; returns (slab, tile)."""
    N, C = x2d.shape
    Np = _round_up(N, PACK)
    if Np != N:
        x2d = jnp.pad(x2d, ((0, Np - N), (0, 0)))
    slab = x2d.reshape(Np // PACK, PACK * C)         # plain reshape (free)
    rows = slab.shape[0]
    tile = _tile_rows(rows)
    rows_p = _round_up(rows, tile)
    if rows_p != rows:
        slab = jnp.pad(slab, ((0, rows_p - rows), (0, 0)))
    return slab, tile


def _unpack_logits(out_packed, B, A):
    return out_packed.reshape(-1, A)[:B, :]


def _call(kernel, slab, tile, wc_packed, wout_packed, bout_packed, B):
    R, CW = slab.shape
    PH = wc_packed.shape[1]
    KW = wc_packed.shape[0]
    A2 = bout_packed.shape[1]
    A = A2 // PACK
    out = pl.pallas_call(
        kernel,
        out_shape=jax.ShapeDtypeStruct((R, A2), jnp.float32),
        grid=(R // tile,),
        in_specs=[
            pl.BlockSpec((tile, CW), lambda i: (i, 0)),
            pl.BlockSpec((KW, PH), lambda i: (0, 0)),
            pl.BlockSpec((A, PH), lambda i: (0, 0)),
            pl.BlockSpec((1, A2), lambda i: (0, 0)),
        ],
        out_specs=pl.BlockSpec((tile, A2), lambda i: (i, 0)),
        compiler_params=pltpu.CompilerParams(
            dimension_semantics=("parallel",)),
    )(slab, wc_packed, wout_packed, bout_packed)
    return _unpack_logits(out, B, A)


@jax.jit
def snn_policy_logits(states, wc_packed, wout_packed, bout_packed):
    """states: [B, D] (time-constant inputs, as in get_action) -> logits [B, A]."""
    B = states.shape[0]
    slab, tile = _pack_and_pad(states)
    kernel = functools.partial(snn_policy_kernel, timesteps=TIMESTEPS)
    return _call(kernel, slab, tile, wc_packed, wout_packed, bout_packed, B)


@jax.jit
def snn_forward(x, wc_packed, wout_packed, bout_packed):
    """General forward pass: x [B, T, D] -> logits [B, A]."""
    B, T, D = x.shape
    slab, tile = _pack_and_pad(x.reshape(B, T * D))
    kernel = functools.partial(snn_seq_kernel, timesteps=T, input_size=D)
    return _call(kernel, slab, tile, wc_packed, wout_packed, bout_packed, B)


def get_action(state, prepared, sample_key):
    """Mirror of OptimizedSNNModel.get_action: state [D] -> (logits, action int)."""
    logits = snn_policy_logits(state[None, :], *prepared)       # [1, A]
    # TODO(synk): Gumbel-max sampling could be fused into the kernel
    # (pltpu.prng_seed + prng_random_bits, int32 action out) to save the extra
    # XLA dispatch at B=1; kept as a separate jax.random.categorical here.
    action = jax.random.categorical(sample_key, logits, axis=-1)[0]
    return logits, int(action)


# ------------------------------ pure-JAX ref -------------------------------- #

def snn_ref(x, w_enc, w_fc, w_out, b_out):
    """Pure-JAX reference mirroring the PyTorch forward (for correctness)."""
    hp = jax.lax.Precision.HIGHEST
    h = jnp.einsum('btd,dh->bth', x, w_enc, precision=hp)
    cur = jnp.einsum('bth,hk->btk', h, w_fc, precision=hp)
    B, T, H = cur.shape
    m = jnp.zeros((B, H), jnp.float32)
    spikes = []
    for t in range(T):
        xt = cur[:, t, :]
        v = ALPHA * m + xt                                   # guessed LIFCell
        z = (v >= THRESHOLD).astype(jnp.float32)
        m = v * (1.0 - z) + ALPHA * v * z                    # exact reset formula
        spikes.append(z)
    pooled = jnp.mean(jnp.stack(spikes, axis=1), axis=1)
    return jnp.dot(pooled, w_out, precision=hp) + b_out.reshape(1, -1)


# ---------------------------------- demo ----------------------------------- #

if __name__ == "__main__":
    key = jax.random.PRNGKey(0)
    k1, k2, k3, k4, k5, k6, k7 = jax.random.split(key, 7)

    # Deterministic PyTorch-style uniform(-1/sqrt(fan_in), 1/sqrt(fan_in)) init.
    lim_enc = 1.0 / (INPUT_SIZE ** 0.5)
    lim_hid = 1.0 / (HIDDEN_SIZE ** 0.5)
    w_enc = jax.random.uniform(k1, (INPUT_SIZE, HIDDEN_SIZE), jnp.float32,
                               -lim_enc, lim_enc)
    w_fc = jax.random.uniform(k2, (HIDDEN_SIZE, HIDDEN_SIZE), jnp.float32,
                              -lim_hid, lim_hid)
    w_out = jax.random.uniform(k3, (HIDDEN_SIZE, OUTPUT_SIZE), jnp.float32,
                               -lim_hid, lim_hid)
    b_out = jax.random.uniform(k4, (OUTPUT_SIZE,), jnp.float32,
                               -lim_hid, lim_hid)

    prepared = prepare_params(w_enc, w_fc, w_out, b_out, TIMESTEPS)

    # 1) get_action on a single state (matches the PyTorch usage).
    state = jnp.array([0.1, -0.2, 0.3, 0.0], dtype=jnp.float32)
    logits, action = get_action(state, prepared, k5)
    logits = jax.block_until_ready(logits)
    assert logits.shape == (1, OUTPUT_SIZE)
    assert bool(jnp.all(jnp.isfinite(logits)))
    assert 0 <= action < OUTPUT_SIZE

    # 2) General forward on a small batched, time-varying sequence vs JAX ref.
    B = 8
    x_seq = 3.0 * jax.random.normal(k6, (B, TIMESTEPS, INPUT_SIZE), jnp.float32)
    out_seq = jax.block_until_ready(snn_forward(x_seq, *prepared))
    ref_seq = snn_ref(x_seq, w_enc, w_fc, w_out, b_out)
    assert out_seq.shape == (B, OUTPUT_SIZE)
    assert bool(jnp.all(jnp.isfinite(out_seq)))
    assert bool(jnp.allclose(out_seq, ref_seq, atol=1e-4, rtol=1e-4))

    # 3) Batched policy path (exercises batch padding and a grid > 1) against
    #    both the reference and the general path on the same states tiled
    #    across time (what get_action does in PyTorch).
    BP = 40                                   # -> 20 packed rows -> 2 grid steps
    states = 3.0 * jax.random.normal(k7, (BP, INPUT_SIZE), jnp.float32)
    fast = jax.block_until_ready(snn_policy_logits(states, *prepared))
    tiled = jnp.tile(states[:, None, :], (1, TIMESTEPS, 1))
    gen = jax.block_until_ready(snn_forward(tiled, *prepared))
    ref_pol = snn_ref(tiled, w_enc, w_fc, w_out, b_out)
    assert fast.shape == (BP, OUTPUT_SIZE)
    assert bool(jnp.allclose(fast, gen, atol=1e-5, rtol=1e-5))
    assert bool(jnp.allclose(fast, ref_pol, atol=1e-4, rtol=1e-4))

    print("KERNEL_OK")
</pallas_src>

<mosaic_0001>
module attributes {stable_mosaic.version = 11 : i64} {
  func.func @snn_policy_kernel(%arg0: i32, %arg1: memref<1x8xf32, #tpu.memory_space<vmem>>, %arg2: memref<8x128xf32, #tpu.memory_space<vmem>>, %arg3: memref<2x128xf32, #tpu.memory_space<vmem>>, %arg4: memref<1x4xf32, #tpu.memory_space<vmem>>, %arg5: memref<1x4xf32, #tpu.memory_space<vmem>>) attributes {dimension_semantics = [#tpu.dimension_semantics<parallel>], iteration_bounds = array<i64: 1>, scalar_prefetch = 0 : i64, scratch_operands = 0 : i64, tpu.core_type = #tpu.core_type<tc>, window_params = [{transform_indices = @transform_0, window_bounds = array<i64: 1, 8>}, {pipeline_mode = #tpu.pipeline_mode<synchronous>, transform_indices = @transform_1, window_bounds = array<i64: 8, 128>}, {pipeline_mode = #tpu.pipeline_mode<synchronous>, transform_indices = @transform_2, window_bounds = array<i64: 2, 128>}, {pipeline_mode = #tpu.pipeline_mode<synchronous>, transform_indices = @transform_3, window_bounds = array<i64: 1, 4>}, {transform_indices = @transform_4, window_bounds = array<i64: 1, 4>}]} {
    %c0 = arith.constant 0 : index
    %c0_0 = arith.constant 0 : index
    %0 = vector.load %arg1[%c0, %c0_0] : memref<1x8xf32, #tpu.memory_space<vmem>>, vector<1x8xf32>
    %c0_1 = arith.constant 0 : index
    %c0_2 = arith.constant 0 : index
    %1 = vector.load %arg2[%c0_1, %c0_2] : memref<8x128xf32, #tpu.memory_space<vmem>>, vector<8x128xf32>
    %2 = vector.extract_strided_slice %0 {offsets = [0, 0], sizes = [1, 1], strides = [1, 1]} : vector<1x8xf32> to vector<1x1xf32>
    %3 = vector.extract_strided_slice %1 {offsets = [0, 0], sizes = [1, 128], strides = [1, 1]} : vector<8x128xf32> to vector<1x128xf32>
    %4 = vector.broadcast %2 : vector<1x1xf32> to vector<1x128xf32>
    %5 = arith.mulf %4, %3 : vector<1x128xf32>
    %6 = vector.extract_strided_slice %0 {offsets = [0, 1], sizes = [1, 1], strides = [1, 1]} : vector<1x8xf32> to vector<1x1xf32>
    %7 = vector.extract_strided_slice %1 {offsets = [1, 0], sizes = [1, 128], strides = [1, 1]} : vector<8x128xf32> to vector<1x128xf32>
    %8 = vector.broadcast %6 : vector<1x1xf32> to vector<1x128xf32>
    %9 = arith.mulf %8, %7 : vector<1x128xf32>
    %10 = arith.addf %5, %9 : vector<1x128xf32>
    %11 = vector.extract_strided_slice %0 {offsets = [0, 2], sizes = [1, 1], strides = [1, 1]} : vector<1x8xf32> to vector<1x1xf32>
    %12 = vector.extract_strided_slice %1 {offsets = [2, 0], sizes = [1, 128], strides = [1, 1]} : vector<8x128xf32> to vector<1x128xf32>
    %13 = vector.broadcast %11 : vector<1x1xf32> to vector<1x128xf32>
    %14 = arith.mulf %13, %12 : vector<1x128xf32>
    %15 = arith.addf %10, %14 : vector<1x128xf32>
    %16 = vector.extract_strided_slice %0 {offsets = [0, 3], sizes = [1, 1], strides = [1, 1]} : vector<1x8xf32> to vector<1x1xf32>
    %17 = vector.extract_strided_slice %1 {offsets = [3, 0], sizes = [1, 128], strides = [1, 1]} : vector<8x128xf32> to vector<1x128xf32>
    %18 = vector.broadcast %16 : vector<1x1xf32> to vector<1x128xf32>
    %19 = arith.mulf %18, %17 : vector<1x128xf32>
    %20 = arith.addf %15, %19 : vector<1x128xf32>
    %21 = vector.extract_strided_slice %0 {offsets = [0, 4], sizes = [1, 1], strides = [1, 1]} : vector<1x8xf32> to vector<1x1xf32>
    %22 = vector.extract_strided_slice %1 {offsets = [4, 0], sizes = [1, 128], strides = [1, 1]} : vector<8x128xf32> to vector<1x128xf32>
    %23 = vector.broadcast %21 : vector<1x1xf32> to vector<1x128xf32>
    %24 = arith.mulf %23, %22 : vector<1x128xf32>
    %25 = arith.addf %20, %24 : vector<1x128xf32>
    %26 = vector.extract_strided_slice %0 {offsets = [0, 5], sizes = [1, 1], strides = [1, 1]} : vector<1x8xf32> to vector<1x1xf32>
    %27 = vector.extract_strided_slice %1 {offsets = [5, 0], sizes = [1, 128], strides = [1, 1]} : vector<8x128xf32> to vector<1x128xf32>
    %28 = vector.broadcast %26 : vector<1x1xf32> to vector<1x128xf32>
    %29 = arith.mulf %28, %27 : vector<1x128xf32>
    %30 = arith.addf %25, %29 : vector<1x128xf32>
    %31 = vector.extract_strided_slice %0 {offsets = [0, 6], sizes = [1, 1], strides = [1, 1]} : vector<1x8xf32> to vector<1x1xf32>
    %32 = vector.extract_strided_slice %1 {offsets = [6, 0], sizes = [1, 128], strides = [1, 1]} : vector<8x128xf32> to vector<1x128xf32>
    %33 = vector.broadcast %31 : vector<1x1xf32> to vector<1x128xf32>
    %34 = arith.mulf %33, %32 : vector<1x128xf32>
    %35 = arith.addf %30, %34 : vector<1x128xf32>
    %36 = vector.extract_strided_slice %0 {offsets = [0, 7], sizes = [1, 1], strides = [1, 1]} : vector<1x8xf32> to vector<1x1xf32>
    %37 = vector.extract_strided_slice %1 {offsets = [7, 0], sizes = [1, 128], strides = [1, 1]} : vector<8x128xf32> to vector<1x128xf32>
    %38 = vector.broadcast %36 : vector<1x1xf32> to vector<1x128xf32>
    %39 = arith.mulf %38, %37 : vector<1x128xf32>
    %40 = arith.addf %35, %39 : vector<1x128xf32>
    %cst = arith.constant 0.000000e+00 : f32
    %41 = vector.broadcast %cst : f32 to vector<1x128xf32>
    %cst_3 = arith.constant 0.000000e+00 : f32
    %42 = vector.broadcast %cst_3 : f32 to vector<1x128xf32>
    %cst_4 = arith.constant 0.899999976 : f32
    %43 = vector.broadcast %cst_4 : f32 to vector<1x128xf32>
    %44 = arith.mulf %43, %41 : vector<1x128xf32>
    %45 = arith.addf %44, %40 : vector<1x128xf32>
    %cst_5 = arith.constant 1.000000e+00 : f32
    %46 = vector.broadcast %cst_5 : f32 to vector<1x128xf32>
    %47 = arith.cmpf oge, %45, %46 : vector<1x128xf32>
    %cst_6 = arith.constant 0.899999976 : f32
    %48 = vector.broadcast %cst_6 : f32 to vector<1x128xf32>
    %49 = arith.mulf %48, %45 : vector<1x128xf32>
    %50 = arith.select %47, %49, %45 : vector<1x128xi1>, vector<1x128xf32>
    %cst_7 = arith.constant 1.000000e+00 : f32
    %51 = vector.broadcast %cst_7 : f32 to vector<1x128xf32>
    %52 = arith.addf %42, %51 : vector<1x128xf32>
    %53 = arith.select %47, %52, %42 : vector<1x128xi1>, vector<1x128xf32>
    %cst_8 = arith.constant 0.899999976 : f32
    %54 = vector.broadcast %cst_8 : f32 to vector<1x128xf32>
    %55 = arith.mulf %54, %50 : vector<1x128xf32>
    %56 = arith.addf %55, %40 : vector<1x128xf32>
    %cst_9 = arith.constant 1.000000e+00 : f32
    %57 = vector.broadcast %cst_9 : f32 to vector<1x128xf32>
    %58 = arith.cmpf oge, %56, %57 : vector<1x128xf32>
    %cst_10 = arith.constant 0.899999976 : f32
    %59 = vector.broadcast %cst_10 : f32 to vector<1x128xf32>
    %60 = arith.mulf %59, %56 : vector<1x128xf32>
    %61 = arith.select %58, %60, %56 : vector<1x128xi1>, vector<1x128xf32>
    %cst_11 = arith.constant 1.000000e+00 : f32
    %62 = vector.broadcast %cst_11 : f32 to vector<1x128xf32>
    %63 = arith.addf %53, %62 : vector<1x128xf32>
    %64 = arith.select %58, %63, %53 : vector<1x128xi1>, vector<1x128xf32>
    %cst_12 = arith.constant 0.899999976 : f32
    %65 = vector.broadcast %cst_12 : f32 to vector<1x128xf32>
    %66 = arith.mulf %65, %61 : vector<1x128xf32>
    %67 = arith.addf %66, %40 : vector<1x128xf32>
    %cst_13 = arith.constant 1.000000e+00 : f32
    %68 = vector.broadcast %cst_13 : f32 to vector<1x128xf32>
    %69 = arith.cmpf oge, %67, %68 : vector<1x128xf32>
    %cst_14 = arith.constant 0.899999976 : f32
    %70 = vector.broadcast %cst_14 : f32 to vector<1x128xf32>
    %71 = arith.mulf %70, %67 : vector<1x128xf32>
    %72 = arith.select %69, %71, %67 : vector<1x128xi1>, vector<1x128xf32>
    %cst_15 = arith.constant 1.000000e+00 : f32
    %73 = vector.broadcast %cst_15 : f32 to vector<1x128xf32>
    %74 = arith.addf %64, %73 : vector<1x128xf32>
    %75 = arith.select %69, %74, %64 : vector<1x128xi1>, vector<1x128xf32>
    %cst_16 = arith.constant 0.899999976 : f32
    %76 = vector.broadcast %cst_16 : f32 to vector<1x128xf32>
    %77 = arith.mulf %76, %72 : vector<1x128xf32>
    %78 = arith.addf %77, %40 : vector<1x128xf32>
    %cst_17 = arith.constant 1.000000e+00 : f32
    %79 = vector.broadcast %cst_17 : f32 to vector<1x128xf32>
    %80 = arith.cmpf oge, %78, %79 : vector<1x128xf32>
    %cst_18 = arith.constant 0.899999976 : f32
    %81 = vector.broadcast %cst_18 : f32 to vector<1x128xf32>
    %82 = arith.mulf %81, %78 : vector<1x128xf32>
    %83 = arith.select %80, %82, %78 : vector<1x128xi1>, vector<1x128xf32>
    %cst_19 = arith.constant 1.000000e+00 : f32
    %84 = vector.broadcast %cst_19 : f32 to vector<1x128xf32>
    %85 = arith.addf %75, %84 : vector<1x128xf32>
    %86 = arith.select %80, %85, %75 : vector<1x128xi1>, vector<1x128xf32>
    %cst_20 = arith.constant 0.899999976 : f32
    %87 = vector.broadcast %cst_20 : f32 to vector<1x128xf32>
    %88 = arith.mulf %87, %83 : vector<1x128xf32>
    %89 = arith.addf %88, %40 : vector<1x128xf32>
    %cst_21 = arith.constant 1.000000e+00 : f32
    %90 = vector.broadcast %cst_21 : f32 to vector<1x128xf32>
    %91 = arith.cmpf oge, %89, %90 : vector<1x128xf32>
    %cst_22 = arith.constant 0.899999976 : f32
    %92 = vector.broadcast %cst_22 : f32 to vector<1x128xf32>
    %93 = arith.mulf %92, %89 : vector<1x128xf32>
    %94 = arith.select %91, %93, %89 : vector<1x128xi1>, vector<1x128xf32>
    %cst_23 = arith.constant 1.000000e+00 : f32
    %95 = vector.broadcast %cst_23 : f32 to vector<1x128xf32>
    %96 = arith.addf %86, %95 : vector<1x128xf32>
    %97 = arith.select %91, %96, %86 : vector<1x128xi1>, vector<1x128xf32>
    %cst_24 = arith.constant 0.899999976 : f32
    %98 = vector.broadcast %cst_24 : f32 to vector<1x128xf32>
    %99 = arith.mulf %98, %94 : vector<1x128xf32>
    %100 = arith.addf %99, %40 : vector<1x128xf32>
    %cst_25 = arith.constant 1.000000e+00 : f32
    %101 = vector.broadcast %cst_25 : f32 to vector<1x128xf32>
    %102 = arith.cmpf oge, %100, %101 : vector<1x128xf32>
    %cst_26 = arith.constant 0.899999976 : f32
    %103 = vector.broadcast %cst_26 : f32 to vector<1x128xf32>
    %104 = arith.mulf %103, %100 : vector<1x128xf32>
    %105 = arith.select %102, %104, %100 : vector<1x128xi1>, vector<1x128xf32>
    %cst_27 = arith.constant 1.000000e+00 : f32
    %106 = vector.broadcast %cst_27 : f32 to vector<1x128xf32>
    %107 = arith.addf %97, %106 : vector<1x128xf32>
    %108 = arith.select %102, %107, %97 : vector<1x128xi1>, vector<1x128xf32>
    %cst_28 = arith.constant 0.899999976 : f32
    %109 = vector.broadcast %cst_28 : f32 to vector<1x128xf32>
    %110 = arith.mulf %109, %105 : vector<1x128xf32>
    %111 = arith.addf %110, %40 : vector<1x128xf32>
    %cst_29 = arith.constant 1.000000e+00 : f32
    %112 = vector.broadcast %cst_29 : f32 to vector<1x128xf32>
    %113 = arith.cmpf oge, %111, %112 : vector<1x128xf32>
    %cst_30 = arith.constant 0.899999976 : f32
    %114 = vector.broadcast %cst_30 : f32 to vector<1x128xf32>
    %115 = arith.mulf %114, %111 : vector<1x128xf32>
    %116 = arith.select %113, %115, %111 : vector<1x128xi1>, vector<1x128xf32>
    %cst_31 = arith.constant 1.000000e+00 : f32
    %117 = vector.broadcast %cst_31 : f32 to vector<1x128xf32>
    %118 = arith.addf %108, %117 : vector<1x128xf32>
    %119 = arith.select %113, %118, %108 : vector<1x128xi1>, vector<1x128xf32>
    %cst_32 = arith.constant 0.899999976 : f32
    %120 = vector.broadcast %cst_32 : f32 to vector<1x128xf32>
    %121 = arith.mulf %120, %116 : vector<1x128xf32>
    %122 = arith.addf %121, %40 : vector<1x128xf32>
    %cst_33 = arith.constant 1.000000e+00 : f32
    %123 = vector.broadcast %cst_33 : f32 to vector<1x128xf32>
    %124 = arith.cmpf oge, %122, %123 : vector<1x128xf32>
    %cst_34 = arith.constant 1.000000e+00 : f32
    %125 = vector.broadcast %cst_34 : f32 to vector<1x128xf32>
    %126 = arith.addf %119, %125 : vector<1x128xf32>
    %127 = arith.select %124, %126, %119 : vector<1x128xi1>, vector<1x128xf32>
    %c0_35 = arith.constant 0 : index
    %c0_36 = arith.constant 0 : index
    %128 = vector.load %arg3[%c0_35, %c0_36] : memref<2x128xf32, #tpu.memory_space<vmem>>, vector<2x128xf32>
    %c0_37 = arith.constant 0 : index
    %c0_38 = arith.constant 0 : index
    %129 = vector.load %arg4[%c0_37, %c0_38] : memref<1x4xf32, #tpu.memory_space<vmem>>, vector<1x4xf32>
    %130 = vector.extract_strided_slice %128 {offsets = [0, 0], sizes = [1, 128], strides = [1, 1]} : vector<2x128xf32> to vector<1x128xf32>
    %131 = arith.mulf %127, %130 : vector<1x128xf32>
    %132 = vector.extract_strided_slice %131 {offsets = [0, 0], sizes = [1, 64], strides = [1, 1]} : vector<1x128xf32> to vector<1x64xf32>
    %cst_39 = arith.constant dense<0.000000e+00> : vector<1xf32>
    %133 = vector.multi_reduction <add>, %132, %cst_39 [1] : vector<1x64xf32> to vector<1xf32>
    %134 = vector.shape_cast %133 : vector<1xf32> to vector<1x1xf32>
    %135 = vector.extract_strided_slice %131 {offsets = [0, 64], sizes = [1, 64], strides = [1, 1]} : vector<1x128xf32> to vector<1x64xf32>
    %cst_40 = arith.constant dense<0.000000e+00> : vector<1xf32>
    %136 = vector.multi_reduction <add>, %135, %cst_40 [1] : vector<1x64xf32> to vector<1xf32>
    %137 = vector.shape_cast %136 : vector<1xf32> to vector<1x1xf32>
    %138 = vector.extract_strided_slice %128 {offsets = [1, 0], sizes = [1, 128], strides = [1, 1]} : vector<2x128xf32> to vector<1x128xf32>
    %139 = arith.mulf %127, %138 : vector<1x128xf32>
    %140 = vector.extract_strided_slice %139 {offsets = [0, 0], sizes = [1, 64], strides = [1, 1]} : vector<1x128xf32> to vector<1x64xf32>
    %cst_41 = arith.constant dense<0.000000e+00> : vector<1xf32>
    %141 = vector.multi_reduction <add>, %140, %cst_41 [1] : vector<1x64xf32> to vector<1xf32>
    %142 = vector.shape_cast %141 : vector<1xf32> to vector<1x1xf32>
    %143 = vector.extract_strided_slice %139 {offsets = [0, 64], sizes = [1, 64], strides = [1, 1]} : vector<1x128xf32> to vector<1x64xf32>
    %cst_42 = arith.constant dense<0.000000e+00> : vector<1xf32>
    %144 = vector.multi_reduction <add>, %143, %cst_42 [1] : vector<1x64xf32> to vector<1xf32>
    %145 = vector.shape_cast %144 : vector<1xf32> to vector<1x1xf32>
    %146 = tpu.concatenate %134, %142, %137, %145 in 1 : vector<1x1xf32>, vector<1x1xf32>, vector<1x1xf32>, vector<1x1xf32> -> vector<1x4xf32>
    %147 = arith.addf %146, %129 : vector<1x4xf32>
    %c0_43 = arith.constant 0 : index
    %c0_44 = arith.constant 0 : index
    %148 = vector.load %arg5[%c0_43, %c0_44] : memref<1x4xf32, #tpu.memory_space<vmem>>, vector<1x4xf32>
    tpu.vector_store %arg5[%c0_43, %c0_44], %147 {strides = array<i32>} : memref<1x4xf32, #tpu.memory_space<vmem>>, vector<1x4xf32>,
    return
  }
  func.func @transform_0(%arg0: i32) -> (i32, i32) {
    %c0_i32 = arith.constant 0 : i32
    %c0_i32_0 = arith.constant 0 : i32
    return %arg0, %c0_i32 : i32, i32
  }
  func.func @transform_1(%arg0: i32) -> (i32, i32) {
    %c0_i32 = arith.constant 0 : i32
    %c0_i32_0 = arith.constant 0 : i32
    %c0_i32_1 = arith.constant 0 : i32
    return %c0_i32, %c0_i32_0 : i32, i32
  }
  func.func @transform_2(%arg0: i32) -> (i32, i32) {
    %c0_i32 = arith.constant 0 : i32
    %c0_i32_0 = arith.constant 0 : i32
    %c0_i32_1 = arith.constant 0 : i32
    return %c0_i32, %c0_i32_0 : i32, i32
  }
  func.func @transform_3(%arg0: i32) -> (i32, i32) {
    %c0_i32 = arith.constant 0 : i32
    %c0_i32_0 = arith.constant 0 : i32
    %c0_i32_1 = arith.constant 0 : i32
    return %c0_i32, %c0_i32_0 : i32, i32
  }
  func.func @transform_4(%arg0: i32) -> (i32, i32) {
    %c0_i32 = arith.constant 0 : i32
    %c0_i32_0 = arith.constant 0 : i32
    return %arg0, %c0_i32 : i32, i32
  }
}

</mosaic_0001>

<bundles_post_ra>
// kernel: snn_policy_logits.1
= control target key start
LH: loop header
LB: loop body
LE: loop exit
PB: predicated region body
PF: predicated region fallthrough
CT: control target
= control target key end

     0   :  { %9 = vsyncpa [#allocation3], 0  ;;  %s342_s0 = inlined_call_operand.vmem [shape: f32[1,8], index: 0, kind: input, shape index: {}]   ;;  %s343_s1 = inlined_call_operand.hbm [shape: f32[8,128], index: 1, kind: input, shape index: {}]   ;;  %s344_s2 = inlined_call_operand.vmem [shape: f32[2,128], index: 2, kind: input, shape index: {}]   ;;  %s345_s3 = inlined_call_operand.vmem [shape: f32[1,4], index: 3, kind: input, shape index: {}]   ;;  %s346_s4 = inlined_call_operand.hbm [shape: f32[1,4], index: 4, kind: output, shape index: {}]  }
   0x1   :  { %10 = vsyncpa [#allocation4], 0  ;;  %s18_s17 = sshll.u32 %s343_s1, 4  ;;  %s290_s18 = smov [#allocation2]   ;;  %s19_s17 = int_to_ptr.hbm [resolvable:$true] %s18_s17 }
   0x2   :  { %s20_s19 = sshll.u32 %s290_s18, 4  ;;  %s21_s19 = int_to_ptr.vmem [resolvable:$true] %s20_s19 }
   0x3   :  { %23 = dma.hbm_to_vmem [thread:$0]  %s19_s17, 128, %s21_s19, [#allocation3]  }
   0x4   :  { %286 = dma.done.wait [#allocation3], 128  }
   0x5   :  { %287 = vsyncadd [#allocation3], 4294967168  ;;  %v291_v0 = vmov 2   ;;  %v292_v1 = vmov 1   ;;  %v293_v2 = vmov 4   ;;  %v294_v4 = vmov 3  }
   0x6   :  { %231 = vset.pattern.permute.xlu1 %v291_v0  ;;  %229 = vset.pattern.permute.xlu0 %v292_v1  ;;  %v32_v3 = vld [vmem:[%s342_s0] sm:$0x1]  ;;  %v295_v5 = vmov 0   ;;  %v296_v6 = vmov 5   ;;  %v297_v7 = vmov 6   ;;  %v298_v8 = vmov 7  }
   0x7   :  { %233 = vset.pattern.permute.xlu2 %v293_v2  ;;  %52 = vperm.xlu1 %231, %v32_v3   ;;  %v33_v14 = vld [vmem:[#allocation2] sm:$0xff]  ;;  %v299_v57 = vmov 0.0   ;;  %vm166_vm8 = vcmask 516096   ;;  %s300_s22 = smov 64   ;;  %vm191_vm9 = vcmask 7168   ;;  %vm193_vm10 = vcmask 15360  }
   0x8   :  { %42 = vperm.xlu0 %229, %v32_v3   ;;  %72 = vperm.xlu2 %233, %v32_v3   ;;  %vm195_vm11 = vcmask 23552   ;;  %s301_s24 = smov [#allocation5]   ;;  %s207_s28 = sshll.u32 %s346_s4, 4  ;;  %vm198_vm12 = vcmask 24576   ;;  %s208_s28 = int_to_ptr.hbm [resolvable:$true] %s207_s28 }
   0x9   :  { %s205_s25 = sshll.u32 %s301_s24, 4  ;;  %s206_s25 = int_to_ptr.vmem [resolvable:$true] %s205_s25 }
   0xf   :  { %232 = vset.pattern.permute.xlu1 %v294_v4 }
  0x10   :  { %230 = vset.pattern.permute.xlu0 %v295_v5  ;;  %62 = vperm.xlu1 %232, %v32_v3  }
  0x11   :  { %36 = vperm.xlu0 %230, %v32_v3   ;;  %234 = vset.pattern.permute.xlu2 %v296_v6 }
  0x12   :  { %82 = vperm.xlu2 %234, %v32_v3  }
  0x18   :  { %235 = vset.pattern.permute.xlu1 %v297_v7 }
  0x19   :  { %237 = vset.pattern.permute.xlu0 %v298_v8  ;;  %92 = vperm.xlu1 %235, %v32_v3  }
  0x1a   :  { %236 = vset.pattern.permute.xlu2 %v298_v8 }
  0x1b   :  { %102 = vperm.xlu2 %236, %v32_v3  }
  0x62   :  { %v73_v9 = vpop.permute.xlu2 %72 }
  0x63   :  { %v75_v20 = vperm.slane %v73_v9, 0 }
  0x65   :  { %v76_v29 = vmul.f32 %v75_v20, %v33_v14 }
  0x67   :  { %v78_v35 = vrot.slane %v76_v29, 4 }
  0x6c   :  { %v83_v12 = vpop.permute.xlu2 %82 }
  0x6d   :  { %v85_v26 = vperm.slane %v83_v12, 0 }
  0x6f   :  { %v86_v34 = vmul.f32 %v85_v26, %v33_v14 }
  0x71   :  { %v88_v41 = vrot.slane %v86_v34, 5 }
  0x75   :  { %v103_v27 = vpop.permute.xlu2 %102 }
  0x76   :  { %v105_v31 = vperm.slane %v103_v27, 0 }
  0x78   :  { %v106_v39 = vmul.f32 %v105_v31, %v33_v14 }
  0x79   :  { %v53_v10 = vpop.permute.xlu1 %52 }
  0x7a   :  { %v43_v11 = vpop.permute.xlu0 %42  ;;  %v55_v15 = vperm.slane %v53_v10, 0  ;;  %v108_v45 = vrot.slane %v106_v39, 7 }
  0x7b   :  { %v45_v13 = vperm.slane %v43_v11, 0 }
  0x7c   :  { %v56_v19 = vmul.f32 %v55_v15, %v33_v14 }
  0x7d   :  { %v46_v16 = vmul.f32 %v45_v13, %v33_v14 }
  0x7e   :  { %v58_v28 = vrot.slane %v56_v19, 2 }
  0x7f   :  { %v48_v23 = vrot.slane %v46_v16, 1 }
  0x82   :  { %v63_v17 = vpop.permute.xlu1 %62 }
  0x83   :  { %v37_v18 = vpop.permute.xlu0 %36  ;;  %v65_v21 = vperm.slane %v63_v17, 0 }
  0x84   :  { %v39_v22 = vperm.slane %v37_v18, 0 }
  0x85   :  { %v66_v24 = vmul.f32 %v65_v21, %v33_v14 }
  0x86   :  { %v40_v25 = vmul.f32 %v39_v22, %v33_v14 }
  0x87   :  { %v68_v32 = vrot.slane %v66_v24, 3 }
  0x88   :  { %v50_v30 = vadd.f32 %v48_v23, %v40_v25  ;;  %v163_v23 = vld [vmem:[%s344_s2] sm:$0x3] }
  0x89   :  { %v178_v27 = vrot.slane %v163_v23, 1 }
  0x8a   :  { %v60_v33 = vadd.f32 %v58_v28, %v50_v30 }
  0x8b   :  { %v93_v37 = vpop.permute.xlu1 %92 }
  0x8c   :  { %v70_v36 = vadd.f32 %v68_v32, %v60_v33  ;;  %v95_v38 = vperm.slane %v93_v37, 0 }
  0x8e   :  { %v80_v40 = vadd.f32 %v78_v35, %v70_v36  ;;  %v96_v42 = vmul.f32 %v95_v38, %v33_v14 }
  0x90   :  { %v90_v43 = vadd.f32 %v88_v41, %v80_v40  ;;  %v98_v44 = vrot.slane %v96_v42, 6  ;;  %v164_v42 = vld [vmem:[%s345_s3] sm:$0x1] }
  0x92   :  { %v100_v46 = vadd.f32 %v98_v44, %v90_v43 }
  0x94   :  { %v110_v47 = vadd.f32 %v108_v45, %v100_v46 }
  0x96   :  { %vm112_vm0 = vcmp.ge.f32.partialorder %v110_v47, 1.0  ;;  %v113_v48 = vmul.f32 0.9, %v110_v47 }
  0x97   :  { %v115_v58 = vsel %vm112_vm0, 1.0, %v299_v57 }
  0x98   :  { %v114_v49 = vsel %vm112_vm0, %v113_v48, %v110_v47  ;;  %v121_v61 = vadd.f32 1.0, %v115_v58 }
  0x99   :  { %v116_v50 = vmul.f32 0.9, %v114_v49 }
  0x9b   :  { %v117_v51 = vadd.f32 %v116_v50, %v110_v47 }
  0x9d   :  { %vm118_vm1 = vcmp.ge.f32.partialorder %v117_v51, 1.0  ;;  %v119_v52 = vmul.f32 0.9, %v117_v51 }
  0x9e   :  { %v122_v63 = vsel %vm118_vm1, %v121_v61, %v115_v58 }
  0x9f   :  { %v120_v53 = vsel %vm118_vm1, %v119_v52, %v117_v51  ;;  %v128_v1 = vadd.f32 1.0, %v122_v63 }
  0xa0   :  { %v123_v54 = vmul.f32 0.9, %v120_v53 }
  0xa2   :  { %v124_v55 = vadd.f32 %v123_v54, %v110_v47 }
  0xa4   :  { %vm125_vm2 = vcmp.ge.f32.partialorder %v124_v55, 1.0  ;;  %v126_v56 = vmul.f32 0.9, %v124_v55 }
  0xa5   :  { %v129_v4 = vsel %vm125_vm2, %v128_v1, %v122_v63 }
  0xa6   :  { %v127_v59 = vsel %vm125_vm2, %v126_v56, %v124_v55  ;;  %v135_v6 = vadd.f32 1.0, %v129_v4 }
  0xa7   :  { %v130_v60 = vmul.f32 0.9, %v127_v59 }
  0xa9   :  { %v131_v62 = vadd.f32 %v130_v60, %v110_v47 }
  0xab   :  { %vm132_vm3 = vcmp.ge.f32.partialorder %v131_v62, 1.0  ;;  %v133_v0 = vmul.f32 0.9, %v131_v62 }
  0xac   :  { %v136_v8 = vsel %vm132_vm3, %v135_v6, %v129_v4 }
  0xad   :  { %v134_v2 = vsel %vm132_vm3, %v133_v0, %v131_v62  ;;  %v142_v11 = vadd.f32 1.0, %v136_v8 }
  0xae   :  { %v137_v3 = vmul.f32 0.9, %v134_v2 }
  0xb0   :  { %v138_v5 = vadd.f32 %v137_v3, %v110_v47 }
  0xb2   :  { %vm139_vm4 = vcmp.ge.f32.partialorder %v138_v5, 1.0  ;;  %v140_v7 = vmul.f32 0.9, %v138_v5 }
  0xb3   :  { %v143_v13 = vsel %vm139_vm4, %v142_v11, %v136_v8 }
  0xb4   :  { %v141_v9 = vsel %vm139_vm4, %v140_v7, %v138_v5  ;;  %v149_v16 = vadd.f32 1.0, %v143_v13 }
  0xb5   :  { %v144_v10 = vmul.f32 0.9, %v141_v9 }
  0xb7   :  { %v145_v12 = vadd.f32 %v144_v10, %v110_v47 }
  0xb9   :  { %vm146_vm5 = vcmp.ge.f32.partialorder %v145_v12, 1.0  ;;  %v147_v14 = vmul.f32 0.9, %v145_v12 }
  0xba   :  { %v150_v18 = vsel %vm146_vm5, %v149_v16, %v143_v13 }
  0xbb   :  { %v148_v15 = vsel %vm146_vm5, %v147_v14, %v145_v12  ;;  %v156_v21 = vadd.f32 1.0, %v150_v18 }
  0xbc   :  { %v151_v17 = vmul.f32 0.9, %v148_v15 }
  0xbe   :  { %v152_v19 = vadd.f32 %v151_v17, %v110_v47 }
  0xc0   :  { %vm153_vm6 = vcmp.ge.f32.partialorder %v152_v19, 1.0  ;;  %v154_v20 = vmul.f32 0.9, %v152_v19 }
  0xc1   :  { %v157_v24 = vsel %vm153_vm6, %v156_v21, %v150_v18 }
  0xc2   :  { %v155_v22 = vsel %vm153_vm6, %v154_v20, %v152_v19  ;;  %v161_v28 = vadd.f32 1.0, %v157_v24 }
  0xc3   :  { %v158_v25 = vmul.f32 0.9, %v155_v22 }
  0xc5   :  { %v159_v26 = vadd.f32 %v158_v25, %v110_v47 }
  0xc7   :  { %vm160_vm7 = vcmp.ge.f32.partialorder %v159_v26, 1.0 }
  0xc8   :  { %v162_v29 = vsel %vm160_vm7, %v161_v28, %v157_v24 }
  0xc9   :  { %v180_v30 = vmul.f32 %v178_v27, %v162_v29  ;;  %v165_v31 = vmul.f32 %v163_v23, %v162_v29 }
  0xcb   :  { %185 = vrot.lane.b32.xlu1 %v180_v30, %s300_s22  ;;  %171 = vrot.lane.b32.xlu0 %v165_v31, %s300_s22  ;;  %v167_v32 = vsel %vm166_vm8, %v165_v31, 0.0  ;;  %v181_v33 = vsel %vm166_vm8, %v180_v30, 0.0 }
  0xcc   :  { %168 = vadd.xlane.f32.xlu2 %v167_v32 }
  0xf5   :  { %182 = vadd.xlane.f32.xlu0 %v181_v33 }
 0x13d   :  { %v186_v34 = vpop.permute.xlu1 %185  ;;  %v172_v35 = vpop.permute.xlu0 %171 }
 0x13e   :  { %v174_v36 = vsel %vm166_vm8, %v172_v35, 0.0  ;;  %v188_v37 = vsel %vm166_vm8, %v186_v34, 0.0 }
 0x13f   :  { %175 = vadd.xlane.f32.xlu1 %v174_v36  ;;  %189 = vadd.xlane.f32.xlu2 %v188_v37  ;;  %v169_v38 = vpop.xlane.xlu2 %168 }
 0x168   :  { %v183_v39 = vpop.xlane.xlu0 %182 }
 0x169   :  { %v192_v40 = vsel %vm191_vm9, %v169_v38, %v183_v39 }
 0x1b2   :  { %v176_v41 = vpop.xlane.xlu1 %175  ;;  %v190_v43 = vpop.xlane.xlu2 %189 }
 0x1b3   :  { %v194_v44 = vsel %vm193_vm10, %v192_v40, %v176_v41 }
 0x1b4   :  { %v196_v45 = vsel %vm195_vm11, %v194_v44, %v190_v43 }
 0x1b5   :  { %v197_v46 = vadd.f32 %v196_v45, %v164_v42 }
 0x1b7   :  { %199 = vst.msk [vmem:[#allocation5] sm:$0x1] %vm198_vm12, %v197_v46 }
 0x1b8   :  { %210 = dma.vmem_to_hbm [thread:$0]  %s206_s25, 16, %s208_s28, [#allocation4]  }
 0x1b9   :  { %288 = dma.done.wait [#allocation4], 16  }
 0x1ba   :  { %289 = vsyncadd [#allocation4], 4294967280 }
 0x1bb   :  { %215 = vsyncpa [#allocation3], 1 }
 0x1bc   :  { %216 = vsyncpa [#allocation4], 1 }

</bundles_post_ra>
